<compile_context>
chip_gen: v7x
topology: tpu7x:2x2x1
jax: 0.10.0
libtpu: 0.0.40
codegen_flags: <defaults>
</compile_context>

<pallas_src>
import jax
import jax.numpy as jnp
from jax.experimental import pallas as pl
from jax.experimental.pallas import tpu as pltpu


def _round_up(x: int, m: int) -> int:
    return ((x + m - 1) // m) * m


def _pick_feature_tile(d: int, tile_d: int) -> int:
    """Largest multiple of 128 dividing d and <= cap; cap halved for v7x
    parallelism only when that keeps the tile >= 256 lanes."""
    if d % 128 != 0:
        return d  # full-dim block: legal for any size, avoids a padded copy
    cap = max(128, (tile_d // 128) * 128)
    if d // 2 >= 256:          # can split into >=2 blocks without dropping below 256
        cap = min(cap, d // 2)
    best = 128
    t = 128
    while t <= min(cap, d):
        if d % t == 0:
            best = t
        t += 128
    return best


def nodes_to_globals_aggregator(nodes, n_node, num_graphs, *, tile_n=None, tile_d=512):
    """Pallas implementation of NodesToGlobalsAggregator with a sum reducer.

    nodes:      [N, D] node features (float dtype; output matches it).
    n_node:     [G]    int array, nodes per graph (contract: sum == N).
    num_graphs: static int G.
    Returns:    [G, D] per-graph summed node features.
    """
    total_nodes, node_dim = nodes.shape
    dtype = nodes.dtype
    itemsize = jnp.dtype(dtype).itemsize

    # --- segment ids (equivalent of utils_torch.repeat) ---
    # Note: if sum(n_node) != N, jnp.repeat pads/truncates silently (module contract).
    graph_index = jnp.arange(num_graphs, dtype=jnp.int32)
    seg = jnp.repeat(graph_index, n_node, total_repeat_length=total_nodes)

    # --- feature-dim tiling (no padding of the node tensor) ---
    td = _pick_feature_tile(node_dim, tile_d)
    grid_d = node_dim // td

    # --- node-dim tiling ---
    if tile_n is None:
        tile_n = 1024 * max(1, 4 // itemsize)   # 1024 f32 / 2048 bf16 / 4096 int8
    budget = 16 * 1024 * 1024                   # double-buffered node block budget
    tn_budget = max(128, (budget // (2 * td * itemsize)) // 128 * 128)
    tn = max(128, min((tile_n // 128) * 128, tn_budget))

    if total_nodes <= tn:
        # Single reduction step; block equals the full node extent.
        tn = total_nodes
        num_k = 1
        ragged = False
        seg_p = seg.reshape(1, total_nodes)
    else:
        num_k = pl.cdiv(total_nodes, tn)
        ragged = (total_nodes % tn) != 0
        n_pad = num_k * tn
        # Cheap 1-D pad of segment ids only; -1 matches no graph row.
        seg_p = jnp.pad(seg, (0, n_pad - total_nodes), constant_values=-1)
        seg_p = seg_p.reshape(1, n_pad)

    g_sub = _round_up(num_graphs, 8)            # sublane-aligned accumulator rows

    def kernel(seg_ref, nodes_ref, out_ref, acc_ref):
        # seg_ref:   (1, tn)   int32 segment id per node (-1 => padding)
        # nodes_ref: (tn, td)  node-feature tile, native dtype
        # out_ref:   (g_sub, td)      per-graph sums for this feature block
        # acc_ref:   (g_sub, td) f32  accumulator carried across the node axis
        k = pl.program_id(1)

        @pl.when(k == 0)
        def _():
            acc_ref[...] = jnp.zeros_like(acc_ref)

        seg_tile = seg_ref[...]                 # (1, tn)
        nodes_tile = nodes_ref[...]             # (tn, td)

        if ragged:
            # Last node block runs past N: zero the garbage rows explicitly.
            # Relying on onehot==0 alone is unsafe (0 * NaN = NaN in the MXU).
            row = jax.lax.broadcasted_iota(jnp.int32, (tn, 1), 0)
            valid = total_nodes - k * tn
            nodes_tile = jnp.where(row < valid, nodes_tile,
                                   jnp.zeros_like(nodes_tile))

        # One-hot segment-assignment matrix (VPU) -> single MXU matmul.
        graph_ids = jax.lax.broadcasted_iota(jnp.int32, (g_sub, tn), 0)
        onehot = (graph_ids == seg_tile).astype(nodes_tile.dtype)
        acc_ref[...] += jnp.dot(onehot, nodes_tile,
                                preferred_element_type=jnp.float32)

        @pl.when(k == pl.num_programs(1) - 1)
        def _():
            out_ref[...] = acc_ref[...].astype(out_ref.dtype)

    # VMEM sizing from actual usage (double-buffered blocks + accumulator).
    vmem_need = (2 * tn * td * itemsize          # nodes
                 + 2 * tn * 4                    # segment ids
                 + g_sub * td * 4                # f32 accumulator
                 + 2 * g_sub * td * itemsize)    # output block
    vmem_limit = int(min(32 << 20, max(2 * vmem_need + (4 << 20), 16 << 20)))

    out = pl.pallas_call(
        kernel,
        out_shape=jax.ShapeDtypeStruct((g_sub, node_dim), dtype),
        grid_spec=pltpu.PrefetchScalarGridSpec(
            num_scalar_prefetch=0,
            grid=(grid_d, num_k),                # (parallel D blocks, reduction N blocks)
            in_specs=[
                pl.BlockSpec((1, tn), lambda d, k: (0, k)),
                pl.BlockSpec((tn, td), lambda d, k: (k, d)),
            ],
            out_specs=pl.BlockSpec((g_sub, td), lambda d, k: (0, d)),
            scratch_shapes=[pltpu.VMEM((g_sub, td), jnp.float32)],
        ),
        compiler_params=pltpu.CompilerParams(
            dimension_semantics=("parallel", "arbitrary"),
            vmem_limit_bytes=vmem_limit,
        ),
        cost_estimate=pl.CostEstimate(
            flops=2 * g_sub * total_nodes * node_dim,
            transcendentals=0,
            bytes_accessed=(total_nodes * node_dim * itemsize    # node stream
                            + total_nodes * 4                    # segment ids
                            + g_sub * node_dim * itemsize),      # globals writeback
        ),
    )(seg_p, nodes)

    return out[:num_graphs]


def _reference(nodes, n_node, num_graphs):
    graph_index = jnp.arange(num_graphs, dtype=jnp.int32)
    seg = jnp.repeat(graph_index, n_node, total_repeat_length=nodes.shape[0])
    return jax.ops.segment_sum(nodes, seg, num_segments=num_graphs)


if __name__ == "__main__":
    key = jax.random.PRNGKey(0)

    # --- small test: single node tile, full-dim feature block (D % 128 != 0) ---
    num_graphs = 4
    node_dim = 32
    n_node = jnp.array([20, 10, 24, 10], dtype=jnp.int32)   # sum = 64
    total_nodes = 64
    k1, k2 = jax.random.split(key)
    nodes = jax.random.normal(k1, (total_nodes, node_dim), dtype=jnp.float32)

    out = nodes_to_globals_aggregator(nodes, n_node, num_graphs)
    out = jax.block_until_ready(out)
    ref = _reference(nodes, n_node, num_graphs)
    assert out.shape == (num_graphs, node_dim)
    assert out.dtype == nodes.dtype
    assert jnp.allclose(out, ref, atol=1e-5, rtol=1e-5)

    # --- larger test: multi-step ragged node axis + 2 parallel feature blocks ---
    num_graphs2 = 5
    node_dim2 = 512
    n_node2 = jnp.array([300, 200, 500, 250, 250], dtype=jnp.int32)  # sum = 1500
    total_nodes2 = 1500
    nodes2 = jax.random.normal(k2, (total_nodes2, node_dim2), dtype=jnp.float32)

    out2 = nodes_to_globals_aggregator(nodes2, n_node2, num_graphs2)
    out2 = jax.block_until_ready(out2)
    ref2 = _reference(nodes2, n_node2, num_graphs2)
    assert out2.shape == (num_graphs2, node_dim2)
    assert jnp.allclose(out2, ref2, atol=1e-3, rtol=1e-4)

    print("KERNEL_OK")
</pallas_src>

<mosaic_0001>
module attributes {stable_mosaic.version = 11 : i64} {
  func.func @kernel(%arg0: i32, %arg1: i32, %arg2: memref<1x64xi32, #tpu.memory_space<vmem>>, %arg3: memref<64x32xf32, #tpu.memory_space<vmem>>, %arg4: memref<8x32xf32, #tpu.memory_space<vmem>>, %arg5: memref<8x32xf32, #tpu.memory_space<vmem>>) attributes {dimension_semantics = [#tpu.dimension_semantics<parallel>, #tpu.dimension_semantics<arbitrary>], iteration_bounds = array<i64: 1, 1>, scalar_prefetch = 0 : i64, scratch_operands = 1 : i64, tpu.core_type = #tpu.core_type<tc>, window_params = [{transform_indices = @transform_0, window_bounds = array<i64: 1, 64>}, {transform_indices = @transform_1, window_bounds = array<i64: 64, 32>}, {transform_indices = @transform_2, window_bounds = array<i64: 8, 32>}]} {
    %c0_i32 = arith.constant 0 : i32
    %0 = arith.cmpi eq, %arg1, %c0_i32 : i32
    %1 = arith.extui %0 : i1 to i32
    %c0_i32_0 = arith.constant 0 : i32
    %2 = arith.cmpi ne, %1, %c0_i32_0 : i32
    scf.if %2 {
      %cst_10 = arith.constant 0.000000e+00 : f32
      %17 = vector.broadcast %cst_10 : f32 to vector<8x32xf32>
      %c0_11 = arith.constant 0 : index
      %c0_12 = arith.constant 0 : index
      %18 = vector.load %arg5[%c0_11, %c0_12] : memref<8x32xf32, #tpu.memory_space<vmem>>, vector<8x32xf32>
      tpu.vector_store %arg5[%c0_11, %c0_12], %17 {strides = array<i32>} : memref<8x32xf32, #tpu.memory_space<vmem>>, vector<8x32xf32>,
    } else {
    }
    %c0 = arith.constant 0 : index
    %c0_1 = arith.constant 0 : index
    %3 = vector.load %arg2[%c0, %c0_1] : memref<1x64xi32, #tpu.memory_space<vmem>>, vector<1x64xi32>
    %c0_2 = arith.constant 0 : index
    %c0_3 = arith.constant 0 : index
    %4 = vector.load %arg3[%c0_2, %c0_3] : memref<64x32xf32, #tpu.memory_space<vmem>>, vector<64x32xf32>
    %5 = tpu.iota {dimensions = array<i32: 0>} : vector<8x64xi32>
    %6 = vector.broadcast %3 : vector<1x64xi32> to vector<8x64xi32>
    %7 = arith.cmpi eq, %5, %6 : vector<8x64xi32>
    %8 = arith.extui %7 : vector<8x64xi1> to vector<8x64xi32>
    %9 = arith.sitofp %8 : vector<8x64xi32> to vector<8x64xf32>
    %c0_4 = arith.constant 0 : index
    %c0_5 = arith.constant 0 : index
    %10 = vector.load %arg5[%c0_4, %c0_5] : memref<8x32xf32, #tpu.memory_space<vmem>>, vector<8x32xf32>
    %cst = arith.constant dense<0.000000e+00> : vector<8x32xf32>
    %11 = tpu.matmul %9, %4, %cst {dimension_numbers = #tpu.dot_dimension_numbers<[1], [0], [0], [1], [0, 0, 1, 1], [], []>} : vector<8x64xf32>, vector<64x32xf32>, vector<8x32xf32> -> vector<8x32xf32>
    %12 = arith.addf %10, %11 : vector<8x32xf32>
    %c0_6 = arith.constant 0 : index
    %c0_7 = arith.constant 0 : index
    %13 = vector.load %arg5[%c0_6, %c0_7] : memref<8x32xf32, #tpu.memory_space<vmem>>, vector<8x32xf32>
    tpu.vector_store %arg5[%c0_6, %c0_7], %12 {strides = array<i32>} : memref<8x32xf32, #tpu.memory_space<vmem>>, vector<8x32xf32>,
    %c0_i32_8 = arith.constant 0 : i32
    %14 = arith.cmpi eq, %arg1, %c0_i32_8 : i32
    %15 = arith.extui %14 : i1 to i32
    %c0_i32_9 = arith.constant 0 : i32
    %16 = arith.cmpi ne, %15, %c0_i32_9 : i32
    scf.if %16 {
      %c0_10 = arith.constant 0 : index
      %c0_11 = arith.constant 0 : index
      %17 = vector.load %arg5[%c0_10, %c0_11] : memref<8x32xf32, #tpu.memory_space<vmem>>, vector<8x32xf32>
      %c0_12 = arith.constant 0 : index
      %c0_13 = arith.constant 0 : index
      %18 = vector.load %arg4[%c0_12, %c0_13] : memref<8x32xf32, #tpu.memory_space<vmem>>, vector<8x32xf32>
      tpu.vector_store %arg4[%c0_12, %c0_13], %17 {strides = array<i32>} : memref<8x32xf32, #tpu.memory_space<vmem>>, vector<8x32xf32>,
    } else {
    }
    return
  }
  func.func @transform_0(%arg0: i32, %arg1: i32) -> (i32, i32) {
    %c0_i32 = arith.constant 0 : i32
    %c0_i32_0 = arith.constant 0 : i32
    return %c0_i32, %arg1 : i32, i32
  }
  func.func @transform_1(%arg0: i32, %arg1: i32) -> (i32, i32) {
    %c0_i32 = arith.constant 0 : i32
    return %arg1, %arg0 : i32, i32
  }
  func.func @transform_2(%arg0: i32, %arg1: i32) -> (i32, i32) {
    %c0_i32 = arith.constant 0 : i32
    %c0_i32_0 = arith.constant 0 : i32
    return %c0_i32, %arg0 : i32, i32
  }
}

</mosaic_0001>

<bundles_post_ra>
// kernel: tpu_custom_call.1
= control target key start
LH: loop header
LB: loop body
LE: loop exit
PB: predicated region body
PF: predicated region fallthrough
CT: control target
= control target key end

     0   :  { %vm16_vm0 = vcmask 261120   ;;  %v204_v3 = vmov 0.0|0.0   ;;  %v205_v6 = vmov 0.0   ;;  %vm206_vm1 = vmmov 0   ;;  %s265_s0 = inlined_call_operand.vmem [shape: s32[1,64], index: 0, kind: input, shape index: {}]   ;;  %s266_s1 = inlined_call_operand.vmem [shape: f32[64,32], index: 1, kind: input, shape index: {}]   ;;  %s267_s2 = inlined_call_operand.hbm [shape: f32[8,32], index: 2, kind: output, shape index: {}]  }
   0x1   :  { %v19_v0 = vld [vmem:[%s266_s1] sm:$0xff]  ;;  %v20_v1 = vld [vmem:[%s266_s1 + $0x8] sm:$0xff]  ;;  %v21_v2 = vld [vmem:[%s266_s1 + $0x10] sm:$0xff]  ;;  %164 = vmatprep.subr.bf16.mxu0 %v204_v3  ;;  %17 = vst.msk [vmem:[#allocation2] sm:$0xff] %vm16_vm0, %v205_v6  ;;  %161 = vmatprep.mubr.msk.f32.mxu0 %vm206_vm1, %v205_v6 }
   0x2   :  { %v165_v4 = vpack.c.bf16 %v20_v1, %v19_v0  ;;  %v22_v5 = vld [vmem:[%s266_s1 + $0x18] sm:$0xff] }
   0x3   :  { %v168_v7 = vpack.c.bf16 %v22_v5, %v21_v2 }
   0x4   :  { %166 = vmatpush3.bf16.msra.mxu0 %v165_v4 }
   0x5   :  { %7 = vsyncpa [#allocation4], 0  ;;  %167 = vmatprep.subr.bf16.mxu0 %v204_v3  ;;  %v23_v8 = vld [vmem:[%s266_s1 + $0x20] sm:$0xff]  ;;  %v24_v9 = vld [vmem:[%s266_s1 + $0x28] sm:$0xff]  ;;  %v27_v10 = vlaneseq  ;;  %vm37_vm3 = vcmask 523264  }
   0x6   :  { %v171_v11 = vpack.c.bf16 %v24_v9, %v23_v8  ;;  %v25_v12 = vld [vmem:[%s266_s1 + $0x30] sm:$0xff]  ;;  %v26_v13 = vld [vmem:[%s266_s1 + $0x38] sm:$0xff]  ;;  %v133_v15 = vld [vmem:[%s265_s0] ss:$0 sm:$0xff]  ;;  %s207_s1 = smov [#allocation3]  }
   0x7   :  { %v28_v14 = vshrl.u32 %v27_v10, 7  ;;  %v174_v16 = vpack.c.bf16 %v26_v13, %v25_v12  ;;  %s125_s27 = sshll.u32 %s207_s1, 4  ;;  %s126_s27 = int_to_ptr.vmem [resolvable:$true] %s125_s27 }
   0x8   :  { %169 = vmatpush3.bf16.msra.mxu0 %v168_v7  ;;  %v36_v18 = vld [vmem:[#allocation2] sm:$0xff]  ;;  %s180_s0 = scalar_lea.vmem %s126_s27, 128  ;;  %p185_p1 = scmp.lt.s32.totalorder %s126_s27, %s126_s27 }
   0x9   :  { %170 = vmatprep.subr.bf16.mxu0 %v204_v3  ;;  %vm33_vm2 = vcmp.eq.s32.totalorder %v28_v14, %v133_v15  ;;  %p181_p0 = scmp.ne.s32.totalorder %s126_s27, %s180_s0  ;;  %p186_p2 = scmp.lt.s32.totalorder %s180_s0, %s180_s0 }
   0xa   :  { %v134_v17 = vsel %vm33_vm2, 1.0, %v205_v6 }
   0xb   :  { %p187_p3 = por %p186_p2, %p185_p1 }
   0xc   :  { %172 = vmatpush3.bf16.msra.mxu0 %v171_v11 }
   0xd   :  { %173 = vmatprep.subr.bf16.mxu0 %v204_v3  ;;  %p188_p4 = pnand %p187_p3, %p181_p0 }
  0x10   :  { %175 = vmatpush3.bf16.msra.mxu0 %v174_v16 }
  0x13   :  { %162 = vmatmul.mubr.msk.f32.vlgmr.msra.gmra.mrb[0].mxu0 %vm37_vm3, %v134_v17 }
  0xe6   :  { %v107_v19 = vpop.f32.mrb[0].mxu0 }
  0xe7   :  { %v111_v20 = vadd.f32 %v107_v19, %v36_v18  ;;  %v163_v21 = vpop.f32.mrb[1].mxu0 }
  0xe9   :  { %113 = vst.msk [vmem:[#allocation2] sm:$0xff] %vm16_vm0, %v111_v20 }
  0xf0   :  { %v117_v22 = vld [vmem:[#allocation2] sm:$0xff] }
  0xf1   :  { %118 = vst.msk [vmem:[#allocation3] sm:$0xff] %vm16_vm0, %v117_v22 }
  0xf2   :  { %191 = shalt.err (!%p188_p4)
}
  0xf3   :  { %s192_s30 = scalar_lea.hbm %s267_s2, 128 }
  0xf4   :  { %p193_p5 = scmp.ne.s32.totalorder %s267_s2, %s192_s30  ;;  %p196_p6 = scmp.lt.u32.totalorder %s192_s30, %s267_s2 }
  0xf6   :  { %p198_p7 = pnand %p196_p6, %p193_p5 }
  0xf8   :  { %201 = shalt.err (!%p198_p7)
}
  0xf9   :  { %128 = dma.vmem_to_hbm [thread:$0]  %s126_s27, 128, %s267_s2, [#allocation4]  }
  0xfa   :  { %202 = dma.done.wait [#allocation4], 128  }
  0xfb   :  { %203 = vsyncadd [#allocation4], 4294967168 }
  0xfc   :  { %132 = vsyncpa [#allocation4], 1 }

</bundles_post_ra>
